<compile_context>
chip_gen: v7x
topology: tpu7x:2x2x1
jax: 0.10.0
libtpu: 0.0.40
codegen_flags: <defaults>
</compile_context>

<pallas_src>
import functools

import jax
import jax.numpy as jnp
from jax.experimental import pallas as pl
from jax.experimental.pallas import tpu as pltpu


def _make_fused_kernel(B, C, H, W, top_size, bottom_size,
                       min_vp, max_vp, vp_top, vp_bottom):
    HW = H * W
    CHW = C * HW
    H_tot = top_size + H + bottom_size
    slab = W * H_tot
    a_coef = 0.5 * float(max_vp - min_vp)          # v = g*a + b  (single FMA)
    b_coef = a_coef + float(min_vp)
    top_fill = float(vp_top) ** (-2.0)             # pads go through pow(-2) too
    bot_fill = float(vp_bottom) ** (-2.0)

    def kernel(z_ref, w_ref, b_ref, xgeo_ref, vel_ref):
        # Generator: tanh(z @ W_aug + b_aug).  LatentInputLayer (z * 1.0) is an
        # identity -> dropped.  bf16 x bf16 on the MXU, f32 accumulate, one pass
        # over all CHW + W*H_tot output columns.
        z = z_ref[...].astype(jnp.bfloat16)                                 # (B, NZ)
        acc = jnp.dot(z, w_ref[...], preferred_element_type=jnp.float32)    # (B, CHW+slab)
        g = jnp.tanh(acc + b_ref[...])                                      # f32

        # x_geo: first CHW columns, NCHW-flat.  Lane-dense (CHW % 128 == 0).
        xgeo_ref[...] = g[:, :CHW]

        # Velocity epilogue: the appended columns are already W-major with the
        # pad positions zero-weighted, so everything below is elementwise.
        gv = g[:, CHW:]                                                     # (B, slab)
        v = gv * a_coef + b_coef                                            # rescale to [min_vp, max_vp]
        inv2 = pl.reciprocal(v * v, approx=False)                           # exact v**(-2)
        col = jax.lax.broadcasted_iota(jnp.int32, (B, slab), 1) % H_tot
        vel = jnp.where(col < top_size, jnp.float32(top_fill),
                        jnp.where(col >= top_size + H, jnp.float32(bot_fill), inv2))
        vel_ref[...] = vel                                                  # single unmasked vst

    return kernel


def prepare_params(w, b, *, C, H, W, top_size, bottom_size):
    """Append a W-major, pad-placed copy of the channel-1 columns to (w, b).

    Done ONCE at parameter-load time (tiny XLA op); this is what lets the kernel
    epilogue skip the in-register transpose and the narrow-piece concatenation.
    """
    NZ = w.shape[0]
    HW = H * W
    H_tot = top_size + H + bottom_size
    w1 = w[:, HW:2 * HW].reshape(NZ, H, W)
    b1 = b[:, HW:2 * HW].reshape(1, H, W)
    w1 = jnp.transpose(w1, (0, 2, 1))                                   # (NZ, W, H)
    b1 = jnp.transpose(b1, (0, 2, 1))
    w1 = jnp.pad(w1, ((0, 0), (0, 0), (top_size, bottom_size)))         # zero cols at pads
    b1 = jnp.pad(b1, ((0, 0), (0, 0), (top_size, bottom_size)))
    w_aug = jnp.concatenate([w, w1.reshape(NZ, W * H_tot)], axis=1)     # stays bf16
    b_aug = jnp.concatenate([b, b1.reshape(1, W * H_tot)], axis=1)      # stays f32
    return w_aug, b_aug


@functools.partial(jax.jit, static_argnames=(
    "min_vp", "max_vp", "vp_top", "vp_bottom", "top_size", "bottom_size",
    "C", "H", "W"))
def half_channels_forward(z, w_aug, b_aug, *, min_vp, max_vp, vp_top, vp_bottom,
                          top_size, bottom_size, C, H, W):
    B, NZ = z.shape
    HW = H * W
    CHW = C * HW
    H_tot = top_size + H + bottom_size
    slab = W * H_tot
    N = CHW + slab
    assert C >= 2 and w_aug.shape == (NZ, N) and b_aug.shape == (1, N)
    # Lane-dense stores: last dims must be multiples of 128 (pad for other
    # geometries).  B a multiple of 8 keeps stores unmasked on the sublane axis.
    assert CHW % 128 == 0 and slab % 128 == 0, \
        "pad C*H*W and W*(top+H+bottom) to multiples of 128"

    kernel = _make_fused_kernel(B, C, H, W, top_size, bottom_size,
                                min_vp, max_vp, vp_top, vp_bottom)

    xgeo_flat, vel_flat = pl.pallas_call(
        kernel,
        out_shape=(
            jax.ShapeDtypeStruct((B, CHW), jnp.float32),    # flat NCHW generator out
            jax.ShapeDtypeStruct((B, slab), jnp.float32),   # padded v^-2, (W, H_tot)-major
        ),
        grid=(1,),                                          # single step: launch-bound kernel
        in_specs=[
            pl.BlockSpec((B, NZ), lambda i: (0, 0)),        # z
            pl.BlockSpec((NZ, N), lambda i: (0, 0)),        # bf16 augmented weights
            pl.BlockSpec((1, N), lambda i: (0, 0)),         # augmented bias
        ],
        out_specs=(
            pl.BlockSpec((B, CHW), lambda i: (0, 0)),
            pl.BlockSpec((B, slab), lambda i: (0, 0)),
        ),
        compiler_params=pltpu.CompilerParams(
            dimension_semantics=("arbitrary",),
            # Tiny tiles; keep scoped VMEM far under v7x's 64 MiB physical.
            vmem_limit_bytes=16 * 1024 * 1024,
        ),
    )(z, w_aug, b_aug)

    x_geo = xgeo_flat.reshape(B, C, H, W)   # free contiguous reshape (matches NCHW)
    x = vel_flat.reshape(1, B, W, H_tot)    # transpose + pads already done in-kernel
    return x, x_geo


# ----------------------------------------------------------------------------
# Pure-JAX reference (mirrors the bf16 weight quantization of the kernel;
# uses the ORIGINAL, un-augmented weights)
# ----------------------------------------------------------------------------
def _reference(z, w_bf16, b, min_vp, max_vp, vp_top, vp_bottom, top_size,
               bottom_size, C, H, W):
    B = z.shape[0]
    acc = jnp.dot(z.astype(jnp.bfloat16), w_bf16,
                  preferred_element_type=jnp.float32)
    x_geo = jnp.tanh(acc + b[0]).reshape(B, C, H, W)
    x = (x_geo[:, 1, :, :] / 2.0 + 0.5) * (max_vp - min_vp) + min_vp
    x = jnp.pad(x, ((0, 0), (top_size, 0), (0, 0)), constant_values=vp_top)
    x = jnp.pad(x, ((0, 0), (0, bottom_size), (0, 0)), constant_values=vp_bottom)
    x = jnp.transpose(x, (0, 2, 1))[None] ** (-2.0)
    return x, x_geo


if __name__ == "__main__":
    # Small, deterministic example shapes.  B=8 fills a sublane group.
    B, NZ = 8, 32          # batch, latent dim
    C, H, W = 2, 16, 16    # generator output: (B, 2, 16, 16), channel 1 used
    min_vp, max_vp = 1.5, 4.0
    vp_top, vp_bottom = 2.0, 2.0
    top_size, bottom_size = 8, 8

    key = jax.random.PRNGKey(0)
    kz, kw, kb = jax.random.split(key, 3)
    z = jax.random.normal(kz, (B, NZ), dtype=jnp.float32)
    # bf16 weights: halves the dominant HBM stream; MXU takes bf16 natively.
    w = (jax.random.normal(kw, (NZ, C * H * W), dtype=jnp.float32) * 0.1
         ).astype(jnp.bfloat16)
    b = jax.random.normal(kb, (1, C * H * W), dtype=jnp.float32) * 0.01

    # One-time parameter prep: append the W-major / pad-placed channel-1 copy.
    w_aug, b_aug = prepare_params(w, b, C=C, H=H, W=W,
                                  top_size=top_size, bottom_size=bottom_size)
    w_aug, b_aug = jax.block_until_ready((w_aug, b_aug))

    x, x_geo = half_channels_forward(
        z, w_aug, b_aug, min_vp=min_vp, max_vp=max_vp, vp_top=vp_top,
        vp_bottom=vp_bottom, top_size=top_size, bottom_size=bottom_size,
        C=C, H=H, W=W)
    jax.block_until_ready((x, x_geo))

    x_ref, x_geo_ref = _reference(
        z, w, b, min_vp, max_vp, vp_top, vp_bottom, top_size, bottom_size,
        C, H, W)
    assert x.shape == (1, B, W, top_size + H + bottom_size), x.shape
    assert x_geo.shape == (B, C, H, W), x_geo.shape
    assert jnp.allclose(x_geo, x_geo_ref, atol=1e-5, rtol=1e-5), \
        float(jnp.max(jnp.abs(x_geo - x_geo_ref)))
    assert jnp.allclose(x, x_ref, atol=1e-5, rtol=1e-5), \
        float(jnp.max(jnp.abs(x - x_ref)))

    print("KERNEL_OK")
</pallas_src>

<mosaic_0001>
module attributes {stable_mosaic.version = 11 : i64} {
  func.func @kernel(%arg0: i32, %arg1: memref<8x32xf32, #tpu.memory_space<vmem>>, %arg2: memref<32x1024xbf16, #tpu.memory_space<vmem>>, %arg3: memref<1x1024xf32, #tpu.memory_space<vmem>>, %arg4: memref<8x512xf32, #tpu.memory_space<vmem>>, %arg5: memref<8x512xf32, #tpu.memory_space<vmem>>) attributes {dimension_semantics = [#tpu.dimension_semantics<arbitrary>], iteration_bounds = array<i64: 1>, scalar_prefetch = 0 : i64, scratch_operands = 0 : i64, tpu.core_type = #tpu.core_type<tc>, window_params = [{pipeline_mode = #tpu.pipeline_mode<synchronous>, transform_indices = @transform_0, window_bounds = array<i64: 8, 32>}, {pipeline_mode = #tpu.pipeline_mode<synchronous>, transform_indices = @transform_1, window_bounds = array<i64: 32, 1024>}, {pipeline_mode = #tpu.pipeline_mode<synchronous>, transform_indices = @transform_2, window_bounds = array<i64: 1, 1024>}, {pipeline_mode = #tpu.pipeline_mode<synchronous>, transform_indices = @transform_3, window_bounds = array<i64: 8, 512>}, {pipeline_mode = #tpu.pipeline_mode<synchronous>, transform_indices = @transform_4, window_bounds = array<i64: 8, 512>}]} {
    %c0 = arith.constant 0 : index
    %c0_0 = arith.constant 0 : index
    %0 = vector.load %arg1[%c0, %c0_0] : memref<8x32xf32, #tpu.memory_space<vmem>>, vector<8x32xf32>
    %1 = arith.truncf %0 : vector<8x32xf32> to vector<8x32xbf16>
    %c0_1 = arith.constant 0 : index
    %c0_2 = arith.constant 0 : index
    %2 = vector.load %arg2[%c0_1, %c0_2] : memref<32x1024xbf16, #tpu.memory_space<vmem>>, vector<32x1024xbf16>
    %cst = arith.constant dense<0.000000e+00> : vector<8x1024xf32>
    %3 = tpu.matmul %1, %2, %cst {dimension_numbers = #tpu.dot_dimension_numbers<[1], [0], [0], [1], [0, 0, 1, 1], [], []>} : vector<8x32xbf16>, vector<32x1024xbf16>, vector<8x1024xf32> -> vector<8x1024xf32>
    %c0_3 = arith.constant 0 : index
    %c0_4 = arith.constant 0 : index
    %4 = vector.load %arg3[%c0_3, %c0_4] : memref<1x1024xf32, #tpu.memory_space<vmem>>, vector<1x1024xf32>
    %5 = vector.broadcast %4 : vector<1x1024xf32> to vector<8x1024xf32>
    %6 = arith.addf %3, %5 : vector<8x1024xf32>
    %7 = math.tanh %6 : vector<8x1024xf32>
    %8 = vector.extract_strided_slice %7 {offsets = [0, 0], sizes = [8, 512], strides = [1, 1]} : vector<8x1024xf32> to vector<8x512xf32>
    %c0_5 = arith.constant 0 : index
    %c0_6 = arith.constant 0 : index
    %9 = vector.load %arg4[%c0_5, %c0_6] : memref<8x512xf32, #tpu.memory_space<vmem>>, vector<8x512xf32>
    tpu.vector_store %arg4[%c0_5, %c0_6], %8 {strides = array<i32>} : memref<8x512xf32, #tpu.memory_space<vmem>>, vector<8x512xf32>,
    %10 = vector.extract_strided_slice %7 {offsets = [0, 512], sizes = [8, 512], strides = [1, 1]} : vector<8x1024xf32> to vector<8x512xf32>
    %cst_7 = arith.constant 1.250000e+00 : f32
    %11 = vector.broadcast %cst_7 : f32 to vector<8x512xf32>
    %12 = arith.mulf %10, %11 : vector<8x512xf32>
    %cst_8 = arith.constant 2.750000e+00 : f32
    %13 = vector.broadcast %cst_8 : f32 to vector<8x512xf32>
    %14 = arith.addf %12, %13 : vector<8x512xf32>
    %15 = arith.mulf %14, %14 : vector<8x512xf32>
    %16 = tpu.reciprocal %15 : vector<8x512xf32> -> vector<8x512xf32>
    %17 = tpu.iota {dimensions = array<i32: 1>} : vector<8x512xi32>
    %c32_i32 = arith.constant 32 : i32
    %c0_i32 = arith.constant 0 : i32
    %18 = arith.cmpi eq, %c32_i32, %c0_i32 : i32
    %c1_i32 = arith.constant 1 : i32
    %19 = arith.select %18, %c1_i32, %c32_i32 : i32
    %20 = vector.broadcast %19 : i32 to vector<8x512xi32>
    %21 = arith.remsi %17, %20 : vector<8x512xi32>
    %c0_i32_9 = arith.constant 0 : i32
    %22 = vector.broadcast %c0_i32_9 : i32 to vector<8x512xi32>
    %23 = arith.cmpi ne, %21, %22 : vector<8x512xi32>
    %c0_i32_10 = arith.constant 0 : i32
    %24 = vector.broadcast %c0_i32_10 : i32 to vector<8x512xi32>
    %25 = arith.cmpi slt, %21, %24 : vector<8x512xi32>
    %c0_i32_11 = arith.constant 0 : i32
    %26 = arith.cmpi slt, %19, %c0_i32_11 : i32
    %27 = vector.broadcast %26 : i1 to vector<8x512xi1>
    %28 = vector.broadcast %27 : vector<8x512xi1> to vector<8x512xi1>
    %29 = arith.xori %25, %28 : vector<8x512xi1>
    %30 = arith.andi %29, %23 : vector<8x512xi1>
    %31 = vector.broadcast %19 : i32 to vector<8x512xi32>
    %32 = arith.addi %21, %31 : vector<8x512xi32>
    %33 = arith.select %30, %32, %21 : vector<8x512xi1>, vector<8x512xi32>
    %c8_i32 = arith.constant 8 : i32
    %34 = vector.broadcast %c8_i32 : i32 to vector<8x512xi32>
    %35 = arith.cmpi slt, %33, %34 : vector<8x512xi32>
    %c24_i32 = arith.constant 24 : i32
    %36 = vector.broadcast %c24_i32 : i32 to vector<8x512xi32>
    %37 = arith.cmpi sge, %33, %36 : vector<8x512xi32>
    %cst_12 = arith.constant 2.500000e-01 : f32
    %38 = vector.broadcast %cst_12 : f32 to vector<8x512xf32>
    %39 = arith.select %37, %38, %16 : vector<8x512xi1>, vector<8x512xf32>
    %cst_13 = arith.constant 2.500000e-01 : f32
    %40 = vector.broadcast %cst_13 : f32 to vector<8x512xf32>
    %41 = arith.select %35, %40, %39 : vector<8x512xi1>, vector<8x512xf32>
    %c0_14 = arith.constant 0 : index
    %c0_15 = arith.constant 0 : index
    %42 = vector.load %arg5[%c0_14, %c0_15] : memref<8x512xf32, #tpu.memory_space<vmem>>, vector<8x512xf32>
    tpu.vector_store %arg5[%c0_14, %c0_15], %41 {strides = array<i32>} : memref<8x512xf32, #tpu.memory_space<vmem>>, vector<8x512xf32>,
    return
  }
  func.func @transform_0(%arg0: i32) -> (i32, i32) {
    %c0_i32 = arith.constant 0 : i32
    %c0_i32_0 = arith.constant 0 : i32
    %c0_i32_1 = arith.constant 0 : i32
    return %c0_i32, %c0_i32_0 : i32, i32
  }
  func.func @transform_1(%arg0: i32) -> (i32, i32) {
    %c0_i32 = arith.constant 0 : i32
    %c0_i32_0 = arith.constant 0 : i32
    %c0_i32_1 = arith.constant 0 : i32
    return %c0_i32, %c0_i32_0 : i32, i32
  }
  func.func @transform_2(%arg0: i32) -> (i32, i32) {
    %c0_i32 = arith.constant 0 : i32
    %c0_i32_0 = arith.constant 0 : i32
    %c0_i32_1 = arith.constant 0 : i32
    return %c0_i32, %c0_i32_0 : i32, i32
  }
  func.func @transform_3(%arg0: i32) -> (i32, i32) {
    %c0_i32 = arith.constant 0 : i32
    %c0_i32_0 = arith.constant 0 : i32
    %c0_i32_1 = arith.constant 0 : i32
    return %c0_i32, %c0_i32_0 : i32, i32
  }
  func.func @transform_4(%arg0: i32) -> (i32, i32) {
    %c0_i32 = arith.constant 0 : i32
    %c0_i32_0 = arith.constant 0 : i32
    %c0_i32_1 = arith.constant 0 : i32
    return %c0_i32, %c0_i32_0 : i32, i32
  }
}

</mosaic_0001>

<bundles_post_ra>
// kernel: half_channels_forward.1
= control target key start
LH: loop header
LB: loop body
LE: loop exit
PB: predicated region body
PF: predicated region fallthrough
CT: control target
= control target key end

     0   :  { %10 = vsyncpa [#allocation3], 0  ;;  %s690_s0 = inlined_call_operand.hbm [shape: f32[8,32], index: 0, kind: input, shape index: {}]   ;;  %s691_s1 = inlined_call_operand.hbm [shape: bf16[32,1024], index: 1, kind: input, shape index: {}]   ;;  %s692_s2 = inlined_call_operand.hbm [shape: f32[1,1024], index: 2, kind: input, shape index: {}]   ;;  %s693_s3 = inlined_call_operand.vmem [shape: f32[8,512], index: 3, kind: output, shape index: {0}]   ;;  %s694_s4 = inlined_call_operand.vmem [shape: f32[8,512], index: 4, kind: output, shape index: {1}]  }
   0x1   :  { %11 = vsyncpa [#allocation5], 0  ;;  %s593_s15 = smov [#allocation4]   ;;  %s523_s19 = scalar_lea.hbm %s691_s1, 2048 }
   0x2   :  { %s27_s16 = sshll.u32 %s593_s15, 4  ;;  %p524_p0 = scmp.ne.s32.totalorder %s691_s1, %s523_s19  ;;  %s28_s16 = int_to_ptr.vmem [resolvable:$true] %s27_s16 }
   0x3   :  { %p527_p1 = scmp.lt.u32.totalorder %s523_s19, %s691_s1 }
   0x5   :  { %p529_p2 = pnand %p527_p1, %p524_p0 }
   0x7   :  { %532 = shalt.err (!%p529_p2)
}
   0x8   :  { %s533_s24 = scalar_lea.vmem %s28_s16, 2048  ;;  %p538_p4 = scmp.lt.s32.totalorder %s28_s16, %s28_s16 }
   0x9   :  { %p534_p3 = scmp.ne.s32.totalorder %s28_s16, %s533_s24  ;;  %p539_p5 = scmp.lt.s32.totalorder %s533_s24, %s533_s24 }
   0xb   :  { %p540_p6 = por %p539_p5, %p538_p4 }
   0xd   :  { %p541_p7 = pnand %p540_p6, %p534_p3 }
   0xf   :  { %544 = shalt.err (!%p541_p7)
}
  0x10   :  { %s594_s25 = smov 512   ;;  %s595_s26 = smov 32  }
  0x11   :  { %33 = dma.hbm_to_vmem [thread:$0]  %s691_s1, 2048, %s28_s16, [#allocation5], %s594_s25, %s594_s25, %s595_s26  }
  0x12   :  { %s596_s29 = smov [#allocation2]   ;;  %s597_s5 = smov [#allocation6]  }
  0x13   :  { %s18_s30 = sshll.u32 %s596_s29, 4  ;;  %s40_s6 = sshll.u32 %s597_s5, 4  ;;  %s19_s30 = int_to_ptr.vmem [resolvable:$true] %s18_s30  ;;  %s41_s6 = int_to_ptr.vmem [resolvable:$true] %s40_s6 }
  0x14   :  { %s545_s9 = scalar_lea.hbm %s690_s0, 128 }
  0x15   :  { %p546_p8 = scmp.ne.s32.totalorder %s690_s0, %s545_s9  ;;  %p549_p9 = scmp.lt.u32.totalorder %s545_s9, %s690_s0 }
  0x17   :  { %p551_p10 = pnand %p549_p9, %p546_p8 }
  0x19   :  { %554 = shalt.err (!%p551_p10)
}
  0x1a   :  { %s555_s1 = scalar_lea.vmem %s19_s30, 128  ;;  %p560_p12 = scmp.lt.s32.totalorder %s19_s30, %s19_s30 }
  0x1b   :  { %p556_p11 = scmp.ne.s32.totalorder %s19_s30, %s555_s1  ;;  %p561_p13 = scmp.lt.s32.totalorder %s555_s1, %s555_s1 }
  0x1d   :  { %p562_p0 = por %p561_p13, %p560_p12 }
  0x1f   :  { %p563_p1 = pnand %p562_p0, %p556_p11 }
  0x21   :  { %566 = shalt.err (!%p563_p1)
}
  0x22   :  { %21 = dma.hbm_to_vmem [thread:$0]  %s690_s0, 128, %s19_s30, [#allocation3]  }
  0x23   :  { %s567_s18 = scalar_lea.hbm %s692_s2, 128 }
  0x24   :  { %p568_p2 = scmp.ne.s32.totalorder %s692_s2, %s567_s18  ;;  %p571_p3 = scmp.lt.u32.totalorder %s567_s18, %s692_s2 }
  0x26   :  { %p573_p4 = pnand %p571_p3, %p568_p2 }
  0x28   :  { %576 = shalt.err (!%p573_p4)
}
  0x29   :  { %s577_s23 = scalar_lea.vmem %s41_s6, 128  ;;  %p582_p6 = scmp.lt.s32.totalorder %s41_s6, %s41_s6 }
  0x2a   :  { %p578_p5 = scmp.ne.s32.totalorder %s41_s6, %s577_s23  ;;  %p583_p7 = scmp.lt.s32.totalorder %s577_s23, %s577_s23 }
  0x2c   :  { %p584_p8 = por %p583_p7, %p582_p6 }
  0x2e   :  { %p585_p9 = pnand %p584_p8, %p578_p5 }
  0x30   :  { %588 = shalt.err (!%p585_p9)
}
  0x31   :  { %43 = dma.hbm_to_vmem [thread:$0]  %s692_s2, 128, %s41_s6, [#allocation5]  }
  0x32   :  { %589 = dma.done.wait [#allocation3], 128  }
  0x33   :  { %590 = vsyncadd [#allocation3], 4294967168 }
  0x34   :  { %591 = dma.done.wait [#allocation5], 2176  }
  0x35   :  { %592 = vsyncadd [#allocation5], 4294965120  ;;  %v598_v0 = vmov 0   ;;  %v56_v1 = vld [vmem:[#allocation4] sm:$0xff]  ;;  %v57_v3 = vld [vmem:[#allocation4 + $0x8] sm:$0xff]  ;;  %vm194_vm0 = vcmask 261120   ;;  %v74_v35 = vlaneseq }
  0x36   :  { %230 = vmatprep.mubr.bf16.mxu0 %v598_v0  ;;  %271 = vmatprep.mubr.bf16.mxu1 %v598_v0  ;;  %v60_v2 = vld [vmem:[#allocation4 + $0x20] sm:$0xff]  ;;  %v61_v5 = vld [vmem:[#allocation4 + $0x28] sm:$0xff]  ;;  %v58_v15 = vld [vmem:[#allocation4 + $0x10] sm:$0xff] }
  0x37   :  { %v474_v4 = vcombine.high %v56_v1, %v60_v2  ;;  %v473_v6 = vcombine.low %v56_v1, %v60_v2  ;;  %v64_v7 = vld [vmem:[#allocation4 + $0x40] sm:$0xff]  ;;  %v476_v9 = vcombine.high %v57_v3, %v61_v5  ;;  %v475_v10 = vcombine.low %v57_v3, %v61_v5  ;;  %v65_v12 = vld [vmem:[#allocation4 + $0x48] sm:$0xff]  ;;  %v62_v16 = vld [vmem:[#allocation4 + $0x30] sm:$0xff] }
  0x38   :  { %v68_v8 = vld [vmem:[#allocation4 + $0x60] sm:$0xff]  ;;  %v69_v13 = vld [vmem:[#allocation4 + $0x68] sm:$0xff]  ;;  %v59_v17 = vld [vmem:[#allocation4 + $0x18] sm:$0xff]  ;;  %v478_v22 = vcombine.high %v58_v15, %v62_v16  ;;  %v477_v29 = vcombine.low %v58_v15, %v62_v16  ;;  %v75_v36 = vshrl.u32 %v74_v35, 7 }
  0x39   :  { %v482_v11 = vcombine.high %v64_v7, %v68_v8  ;;  %198 = vmatprep.subr.bf16.mxu0 %v474_v4  ;;  %v484_v14 = vcombine.high %v65_v12, %v69_v13  ;;  %239 = vmatprep.subr.bf16.mxu1 %v476_v9  ;;  %v481_v18 = vcombine.low %v64_v7, %v68_v8  ;;  %v54_v19 = vld [vmem:[#allocation2] sm:$0xff]  ;;  %v66_v24 = vld [vmem:[#allocation4 + $0x50] sm:$0xff]  ;;  %v72_v38 = vld [vmem:[#allocation6] sm:$0xff] }
  0x3a   :  { %199 = vmatpush1.bf16.msra.mxu0 %v473_v6  ;;  %v63_v20 = vld [vmem:[#allocation4 + $0x38] sm:$0xff]  ;;  %240 = vmatpush1.bf16.msra.mxu1 %v475_v10  ;;  %v483_v21 = vcombine.low %v65_v12, %v69_v13  ;;  %v70_v25 = vld [vmem:[#allocation4 + $0x70] sm:$0xff]  ;;  %v55_v26 = vpack.c.bf16 %v54_v19, %v54_v19  ;;  %v76_v37 = vsub.s32 0, %v75_v36  ;;  %v84_v39 = vsub.s32 2, %v75_v36 }
  0x3b   :  { %200 = vmatprep.subr.bf16.mxu0 %v482_v11  ;;  %241 = vmatprep.subr.bf16.mxu1 %v484_v14  ;;  %v480_v23 = vcombine.high %v59_v17, %v63_v20  ;;  %v67_v27 = vld [vmem:[#allocation4 + $0x58] sm:$0xff]  ;;  %v479_v30 = vcombine.low %v59_v17, %v63_v20  ;;  %v486_v31 = vcombine.high %v66_v24, %v70_v25  ;;  %v80_v40 = vsub.s32 1, %v75_v36 }
  0x3c   :  { %v71_v28 = vld [vmem:[#allocation4 + $0x78] sm:$0xff]  ;;  %v485_v33 = vcombine.low %v66_v24, %v70_v25  ;;  %v88_v41 = vsub.s32 3, %v75_v36  ;;  %v77_v42 = vrot.slane %v72_v38, %v76_v37  ;;  %v85_v43 = vrot.slane %v72_v38, %v84_v39 }
  0x3d   :  { %v488_v32 = vcombine.high %v67_v27, %v71_v28  ;;  %v487_v34 = vcombine.low %v67_v27, %v71_v28  ;;  %v81_v44 = vrot.slane %v72_v38, %v80_v40  ;;  %v92_v50 = vsub.s32 4, %v75_v36 }
  0x3e   :  { %201 = vmatpush1.bf16.msra.mxu0 %v481_v18  ;;  %242 = vmatpush1.bf16.msra.mxu1 %v483_v21  ;;  %v89_v45 = vrot.slane %v72_v38, %v88_v41  ;;  %v100_v55 = vsub.s32 6, %v75_v36  ;;  %v96_v56 = vsub.s32 5, %v75_v36  ;;  %v104_v60 = vsub.s32 7, %v75_v36 }
  0x3f   :  { %280 = vmatprep.subr.bf16.mxu0 %v478_v22  ;;  %321 = vmatprep.subr.bf16.mxu1 %v480_v23  ;;  %v93_v62 = vrot.slane %v72_v38, %v92_v50 }
  0x40   :  { %v101_v63 = vrot.slane %v72_v38, %v100_v55  ;;  %v105_v1 = vrot.slane %v72_v38, %v104_v60 }
  0x41   :  { %489 = vmatmul.mubr.msk.bf16.vlgmr.msra.gmra.mrb[0].mxu0 %vm194_vm0, %v55_v26  ;;  %490 = vmatmul.mubr.msk.bf16.vlgmr.msra.gmra.mrb[0].mxu1 %vm194_vm0, %v55_v26 }
  0x42   :  { %281 = vmatpush1.bf16.msra.mxu0 %v477_v29  ;;  %322 = vmatpush1.bf16.msra.mxu1 %v479_v30 }
  0x43   :  { %282 = vmatprep.subr.bf16.mxu0 %v486_v31  ;;  %323 = vmatprep.subr.bf16.mxu1 %v488_v32 }
  0x44   :  { %312 = vmatprep.mubr.bf16.mxu0 %v598_v0  ;;  %353 = vmatprep.mubr.bf16.mxu1 %v598_v0  ;;  %v97_v0 = vrot.slane %v72_v38, %v96_v56 }
  0x46   :  { %283 = vmatpush1.bf16.msra.mxu0 %v485_v33  ;;  %324 = vmatpush1.bf16.msra.mxu1 %v487_v34 }
  0x49   :  { %491 = vmatmul.mubr.msk.bf16.vlgmr.msra.gmra.mrb[4].mxu0 %vm194_vm0, %v55_v26  ;;  %492 = vmatmul.mubr.msk.bf16.vlgmr.msra.gmra.mrb[4].mxu1 %vm194_vm0, %v55_v26  ;;  %v391_v26 = vand.u32 127, %v74_v35 }
  0x4b   :  { %v393_v34 = vadd.s32 256, %v391_v26  ;;  %v392_v37 = vadd.s32 128, %v391_v26  ;;  %v394_v38 = vadd.s32 384, %v391_v26  ;;  %v399_v39 = vand.u32 31, %v391_v26 }
  0x4d   :  { %v413_v40 = vand.u32 31, %v393_v34  ;;  %v406_v41 = vand.u32 31, %v392_v37  ;;  %vm447_vm1 = vcmp.ge.s32.totalorder %v399_v39, 24  ;;  %vm443_vm2 = vcmp.lt.s32.totalorder %v399_v39, 8 }
  0x4f   :  { %vm449_vm3 = vcmp.ge.s32.totalorder %v413_v40, 24  ;;  %vm445_vm4 = vcmp.lt.s32.totalorder %v413_v40, 8  ;;  %vm448_vm5 = vcmp.ge.s32.totalorder %v406_v41, 24  ;;  %vm444_vm6 = vcmp.lt.s32.totalorder %v406_v41, 8 }
 0x114   :  { %v232_v46 = vpop.f32.mrb[0].mxu0  ;;  %v273_v48 = vpop.f32.mrb[0].mxu1 }
 0x115   :  { %v233_v47 = vadd.f32 %v232_v46, %v77_v42  ;;  %v234_v49 = vpop.f32.mrb[1].mxu0  ;;  %v274_v51 = vadd.f32 %v273_v48, %v85_v43  ;;  %v275_v53 = vpop.f32.mrb[1].mxu1  ;;  %v420_v42 = vand.u32 31, %v394_v38 }
 0x116   :  { %v235_v52 = vadd.f32 %v234_v49, %v81_v44  ;;  %v236_v54 = vpop.f32.mrb[2].mxu0  ;;  %v276_v57 = vadd.f32 %v275_v53, %v89_v45  ;;  %v277_v58 = vpop.f32.mrb[2].mxu1 }
 0x117   :  { %499 = vtanh.f32 %v233_v47  ;;  %v237_v59 = vpop.f32.mrb[3].mxu0  ;;  %v278_v61 = vpop.f32.mrb[3].mxu1  ;;  %vm450_vm7 = vcmp.ge.s32.totalorder %v420_v42, 24  ;;  %vm446_vm8 = vcmp.lt.s32.totalorder %v420_v42, 8 }
 0x118   :  { %501 = vtanh.f32 %v274_v51 }
 0x119   :  { %503 = vtanh.f32 %v235_v52 }
 0x11a   :  { %505 = vtanh.f32 %v276_v57 }
 0x11c   :  { %v314_v2 = vpop.f32.mrb[4].mxu0  ;;  %v355_v4 = vpop.f32.mrb[4].mxu1 }
 0x11d   :  { %v315_v3 = vadd.f32 %v314_v2, %v93_v62  ;;  %v316_v5 = vpop.f32.mrb[5].mxu0  ;;  %v356_v6 = vadd.f32 %v355_v4, %v101_v63  ;;  %v357_v8 = vpop.f32.mrb[5].mxu1 }
 0x11e   :  { %v317_v7 = vadd.f32 %v316_v5, %v97_v0  ;;  %v318_v9 = vpop.f32.mrb[6].mxu0  ;;  %v358_v10 = vadd.f32 %v357_v8, %v105_v1  ;;  %v359_v11 = vpop.f32.mrb[6].mxu1 }
 0x11f   :  { %507 = vtanh.f32 %v315_v3  ;;  %v319_v12 = vpop.f32.mrb[7].mxu0  ;;  %v360_v13 = vpop.f32.mrb[7].mxu1 }
 0x120   :  { %509 = vtanh.f32 %v356_v6 }
 0x121   :  { %v500_v14 = vpop.eup %499  ;;  %511 = vtanh.f32 %v317_v7 }
 0x122   :  { %v502_v15 = vpop.eup %501  ;;  %370 = vst [vmem:[%s693_s3] sm:$0xff] %v500_v14  ;;  %513 = vtanh.f32 %v358_v10 }
 0x123   :  { %v504_v16 = vpop.eup %503  ;;  %372 = vst [vmem:[%s693_s3 + $0x10] sm:$0xff] %v502_v15 }
 0x124   :  { %v506_v17 = vpop.eup %505  ;;  %371 = vst [vmem:[%s693_s3 + $0x8] sm:$0xff] %v504_v16 }
 0x125   :  { %373 = vst [vmem:[%s693_s3 + $0x18] sm:$0xff] %v506_v17 }
 0x129   :  { %v508_v18 = vpop.eup %507 }
 0x12a   :  { %v510_v19 = vpop.eup %509  ;;  %v374_v20 = vmul.f32 1.25, %v508_v18 }
 0x12b   :  { %v512_v21 = vpop.eup %511  ;;  %v376_v22 = vmul.f32 1.25, %v510_v19 }
 0x12c   :  { %v514_v23 = vpop.eup %513  ;;  %v378_v24 = vadd.f32 2.75, %v374_v20  ;;  %v375_v25 = vmul.f32 1.25, %v512_v21 }
 0x12d   :  { %v380_v27 = vadd.f32 2.75, %v376_v22  ;;  %v377_v28 = vmul.f32 1.25, %v514_v23 }
 0x12e   :  { %v382_v29 = vmul.f32 %v378_v24, %v378_v24  ;;  %v379_v30 = vadd.f32 2.75, %v375_v25 }
 0x12f   :  { %v384_v31 = vmul.f32 %v380_v27, %v380_v27  ;;  %v381_v32 = vadd.f32 2.75, %v377_v28 }
 0x130   :  { %515 = vrcp.f32 %v382_v29  ;;  %v383_v33 = vmul.f32 %v379_v30, %v379_v30 }
 0x131   :  { %517 = vrcp.f32 %v384_v31  ;;  %v385_v36 = vmul.f32 %v381_v32, %v381_v32 }
 0x132   :  { %519 = vrcp.f32 %v383_v33 }
 0x133   :  { %521 = vrcp.f32 %v385_v36 }
 0x13a   :  { %v516_v35 = vpop.eup %515 }
 0x13b   :  { %v518_v43 = vpop.eup %517  ;;  %v451_v44 = vsel %vm447_vm1, 0.25, %v516_v35 }
 0x13c   :  { %v520_v45 = vpop.eup %519  ;;  %v455_v46 = vsel %vm443_vm2, 0.25, %v451_v44  ;;  %v453_v47 = vsel %vm449_vm3, 0.25, %v518_v43 }
 0x13d   :  { %v522_v48 = vpop.eup %521  ;;  %459 = vst [vmem:[%s694_s4] sm:$0xff] %v455_v46  ;;  %v457_v49 = vsel %vm445_vm4, 0.25, %v453_v47  ;;  %v452_v50 = vsel %vm448_vm5, 0.25, %v520_v45 }
 0x13e   :  { %461 = vst [vmem:[%s694_s4 + $0x10] sm:$0xff] %v457_v49  ;;  %v456_v51 = vsel %vm444_vm6, 0.25, %v452_v50  ;;  %v454_v52 = vsel %vm450_vm7, 0.25, %v522_v48 }
 0x13f   :  { %460 = vst [vmem:[%s694_s4 + $0x8] sm:$0xff] %v456_v51  ;;  %v458_v53 = vsel %vm446_vm8, 0.25, %v454_v52 }
 0x140   :  { %462 = vst [vmem:[%s694_s4 + $0x18] sm:$0xff] %v458_v53 }
 0x141   :  { %471 = vsyncpa [#allocation3], 1 }
 0x142   :  { %472 = vsyncpa [#allocation5], 1 }

</bundles_post_ra>
